<compile_context>
chip_gen: v5e
topology: v5e:2x2
jax: 0.10.0
libtpu: 0.0.40
codegen_flags: <defaults>
</compile_context>

<pallas_src>
import functools
import math

import jax
import jax.numpy as jnp
from jax.experimental import pallas as pl
from jax.experimental.pallas import tpu as pltpu


_TARGET_BLOCK_BYTES = 4 << 20   # ~4 MiB per largest block
_VMEM_LIMIT_BYTES = 48 << 20    # < v7x 64 MiB physical; > v5e 16 MiB default
_LANE = 128


def _compiler_params(n_axes):
    return pltpu.CompilerParams(
        dimension_semantics=("parallel",) * n_axes,
        vmem_limit_bytes=_VMEM_LIMIT_BYTES)


def _pick_row_tile(n_rows, row_bytes, target=_TARGET_BLOCK_BYTES):
    """Rows per block: either full n_rows, or a multiple of 8 near `target` bytes."""
    rt = max(int(target // max(int(row_bytes), 1)), 1)
    if rt >= n_rows:
        return n_rows
    rt = (rt // 8) * 8
    if rt < 8:
        rt = min(8, n_rows)
    return rt


# ----------------------------- kernels -------------------------------------

def _eltwise_kernel(x_ref, o_ref, *, act, negslope, alpha, weight):
    x = x_ref[...]
    if act == "relu":                       # compare/select: native dtype
        y = jnp.maximum(x, 0)
    elif act == "relu6":
        y = jnp.clip(x, 0, 6)
    elif act == "lklu":
        y = jnp.where(x >= 0, x, x * negslope)
    elif act == "prelu":
        y = jnp.where(x >= 0, x, x * weight)
    else:                                   # transcendental: compute in f32
        xf = x.astype(jnp.float32)
        if act == "elu":
            y = jnp.where(xf > 0, xf, alpha * (jnp.exp(xf) - 1.0))
        elif act == "tanh":
            y = jnp.tanh(xf)
        elif act == "sigm":
            y = jax.nn.sigmoid(xf)
        elif act == "swish":
            y = xf * jax.nn.sigmoid(xf)
        elif act == "mish":
            # mish(x) = x * tanh(softplus(x)) == x * u / (u + 2),  u = t*(t+2),
            # t = exp(x).  Exact; one transcendental instead of three.
            t = jnp.exp(jnp.minimum(xf, 20.0))
            u = t * (t + 2.0)
            y = jnp.where(xf > 20.0, xf, xf * u / (u + 2.0))
        else:
            raise ValueError(f"bad elementwise activation: {act}")
    o_ref[...] = y.astype(o_ref.dtype)


def _maxo_kernel(x_ref, o_ref, *, relu_after):
    # x_ref: (rb, 2, ct) -- both channel halves of a row/column tile.
    xx = x_ref[...]
    y = jnp.maximum(xx[:, 0, :], xx[:, 1, :])
    if relu_after:
        # relu(max(a, b)) == max(relu(a), relu(b))  (relu is monotone)
        y = jnp.maximum(y, 0)
    o_ref[...] = y.astype(o_ref.dtype)


def _squash_kernel(x_ref, o_ref):
    # x_ref: (rb, D); reduction over the (possibly lane-masked) last dim.
    x = x_ref[...].astype(jnp.float32)
    ss = jnp.sum(x * x, axis=-1, keepdims=True)
    # ss/(1+ss) * x / sqrt(ss)  ==  x * ss / ((1+ss)*sqrt(ss))
    # Matches the PyTorch reference exactly, incl. NaN for an all-zero row.
    scale = ss / ((1.0 + ss) * jnp.sqrt(ss))
    o_ref[...] = (x * scale).astype(o_ref.dtype)


# --------------------------- pallas launchers --------------------------------

def _elementwise_2d(x2, kern, out_dtype):
    R, C = x2.shape
    rb = _pick_row_tile(R, C * x2.dtype.itemsize)
    spec = pl.BlockSpec((rb, C), lambda i: (i, 0))
    return pl.pallas_call(
        kern,
        grid=(pl.cdiv(R, rb),),
        out_shape=jax.ShapeDtypeStruct((R, C), out_dtype),
        in_specs=[spec],
        out_specs=spec,
        compiler_params=_compiler_params(1),
    )(x2)


def _elementwise(x, kern):
    n = x.size
    cols = None
    for c in (1024, 512, 256, 128):
        if n % c == 0:
            cols = c
            break
    if cols is None:
        # Rare path: total size not a multiple of 128.
        # TODO(synk): mask the last block in-kernel instead of pad+slice.
        pad = (-n) % 1024
        flat = jnp.pad(x.reshape(-1), (0, pad))
        y = _elementwise_2d(flat.reshape(-1, 1024), kern, x.dtype)
        return y.reshape(-1)[:n].reshape(x.shape)
    y = _elementwise_2d(x.reshape(n // cols, cols), kern, x.dtype)
    return y.reshape(x.shape)


def _maxout(x, relu_after):
    if x.shape[1] % 2 != 0:
        raise ValueError(
            "MaxOut: tensor.size(1) must be divisible by n_splits: "
            f"{x.shape[1]}")
    B = x.shape[0]
    half = x.shape[1] // 2
    K = half * math.prod(x.shape[2:])
    itemsize = x.dtype.itemsize
    x3 = x.reshape(B, 2, K)                 # free view of contiguous NCHW

    # Column tiling only when the full-K block would be too large and K is
    # lane-aligned; otherwise keep the full last dim (always legal).
    if K % _LANE == 0 and 2 * K * itemsize * 8 > _TARGET_BLOCK_BYTES:
        ct = max((_TARGET_BLOCK_BYTES // (2 * 8 * itemsize)) // _LANE * _LANE,
                 _LANE)
        ct = min(ct, K)
    else:
        ct = K
    rb = _pick_row_tile(B, 2 * ct * itemsize)

    kern = functools.partial(_maxo_kernel, relu_after=relu_after)
    y = pl.pallas_call(
        kern,
        grid=(pl.cdiv(B, rb), pl.cdiv(K, ct)),
        out_shape=jax.ShapeDtypeStruct((B, K), x.dtype),
        in_specs=[pl.BlockSpec((rb, 2, ct), lambda i, j: (i, 0, j))],
        out_specs=pl.BlockSpec((rb, ct), lambda i, j: (i, j)),
        compiler_params=_compiler_params(2),
    )(x3)
    return y.reshape((B, half) + tuple(x.shape[2:]))


def _squash(x):
    if x.ndim != 3:
        raise ValueError(f"Squash requires 3D tensors: {x.ndim}")
    B, N, D = x.shape
    R = B * N
    x2 = x.reshape(R, D)                    # free view; full D kept as lanes
    rb = _pick_row_tile(R, D * x.dtype.itemsize)
    spec = pl.BlockSpec((rb, D), lambda i: (i, 0))
    y = pl.pallas_call(
        _squash_kernel,
        grid=(pl.cdiv(R, rb),),
        out_shape=jax.ShapeDtypeStruct((R, D), x.dtype),
        in_specs=[spec],
        out_specs=spec,
        compiler_params=_compiler_params(1),
    )(x2)
    return y.reshape(B, N, D)


# --------------------------- module analog ----------------------------------

class Activations:
    """JAX/Pallas analog of tensormonk Activations (forward only)."""

    def __init__(self, tensor_size, activation: str = "relu", **kwargs):
        if activation is not None:
            activation = activation.lower()
        if activation not in self.available():
            raise ValueError(
                "activation: Invalid activation "
                + "/".join(self.available()) + f": {activation}")
        self.t_size = tensor_size
        self.activation = activation
        self.negslope = kwargs.get("lklu_negslope", 0.01)
        self.alpha = kwargs.get("elu_alpha", 1.0)
        # torch.ones(1) * 0.1 -> constant 0.1 at init time.
        # TODO(synk): if the PReLU weight is ever learned / per-channel, pass
        # it as an SMEM scalar or per-channel VMEM input instead of baking it.
        self.weight = 0.1
        self.tensor_size = (
            tensor_size if activation not in ("maxo", "rmxo")
            else (None, tensor_size[1] // 2, tensor_size[2], tensor_size[3]))

    @staticmethod
    def available():
        return ["elu", "lklu", "maxo", "mish", "prelu", "relu", "relu6",
                "rmxo", "sigm", "squash", "swish", "tanh"]

    def __call__(self, x):
        act = self.activation
        if act in ("maxo", "rmxo"):
            return _maxout(x, relu_after=(act == "rmxo"))
        if act == "squash":
            return _squash(x)
        kern = functools.partial(
            _eltwise_kernel, act=act, negslope=self.negslope,
            alpha=self.alpha, weight=self.weight)
        return _elementwise(x, kern)


# ------------------------------- main ---------------------------------------

if __name__ == "__main__":
    key = jax.random.PRNGKey(0)
    k1, k2 = jax.random.split(key)
    x4 = jax.random.normal(k1, (2, 4, 16, 16), dtype=jnp.float32)  # NCHW
    x3 = jax.random.normal(k2, (2, 8, 32), dtype=jnp.float32)      # (B, N, D)

    relu = lambda t: jnp.maximum(t, 0.0)
    refs = {
        "relu":  relu,
        "relu6": lambda t: jnp.clip(t, 0.0, 6.0),
        "lklu":  lambda t: jnp.where(t >= 0, t, 0.01 * t),
        "elu":   lambda t: jnp.where(t > 0, t, 1.0 * (jnp.exp(t) - 1.0)),
        "prelu": lambda t: jnp.where(t >= 0, t, 0.1 * t),
        "tanh":  jnp.tanh,
        "sigm":  jax.nn.sigmoid,
        "swish": lambda t: t * jax.nn.sigmoid(t),
        "mish":  lambda t: t * jnp.tanh(jax.nn.softplus(t)),
        "maxo":  lambda t: jnp.maximum(t[:, :2], t[:, 2:]),
        "rmxo":  lambda t: jnp.maximum(relu(t)[:, :2], relu(t)[:, 2:]),
    }

    for act in Activations.available():
        if act == "squash":
            mod = Activations((None, 8, 32), act)
            xin = x3
            ss = jnp.sum(x3 * x3, axis=2, keepdims=True)
            ref = ss / (1.0 + ss) * x3 / jnp.sqrt(ss)
        else:
            mod = Activations((None, 4, 16, 16), act)
            xin = x4
            ref = refs[act](x4)

        y = jax.block_until_ready(mod(xin))
        assert y.shape == ref.shape, (act, y.shape, ref.shape)
        assert jnp.allclose(y, ref, atol=1e-5, rtol=1e-5), f"mismatch: {act}"

    print("KERNEL_OK")
</pallas_src>

<mosaic_0001>
module attributes {stable_mosaic.version = 11 : i64} {
  func.func @_eltwise_kernel(%arg0: i32, %arg1: memref<2x1024xf32, #tpu.memory_space<vmem>>, %arg2: memref<2x1024xf32, #tpu.memory_space<vmem>>) attributes {dimension_semantics = [#tpu.dimension_semantics<parallel>], iteration_bounds = array<i64: 1>, scalar_prefetch = 0 : i64, scratch_operands = 0 : i64, tpu.core_type = #tpu.core_type<tc>, window_params = [{transform_indices = @transform_0, window_bounds = array<i64: 2, 1024>}, {transform_indices = @transform_1, window_bounds = array<i64: 2, 1024>}]} {
    %c0 = arith.constant 0 : index
    %c0_0 = arith.constant 0 : index
    %0 = vector.load %arg1[%c0, %c0_0] : memref<2x1024xf32, #tpu.memory_space<vmem>>, vector<2x1024xf32>
    %cst = arith.constant 0.000000e+00 : f32
    %1 = vector.broadcast %cst : f32 to vector<2x1024xf32>
    %2 = arith.cmpf ogt, %0, %1 : vector<2x1024xf32>
    %3 = math.exp %0 : vector<2x1024xf32>
    %cst_1 = arith.constant 1.000000e+00 : f32
    %4 = vector.broadcast %cst_1 : f32 to vector<2x1024xf32>
    %5 = arith.subf %3, %4 : vector<2x1024xf32>
    %cst_2 = arith.constant 1.000000e+00 : f32
    %6 = vector.broadcast %cst_2 : f32 to vector<2x1024xf32>
    %7 = arith.mulf %6, %5 : vector<2x1024xf32>
    %8 = arith.select %2, %0, %7 : vector<2x1024xi1>, vector<2x1024xf32>
    %c0_3 = arith.constant 0 : index
    %c0_4 = arith.constant 0 : index
    %9 = vector.load %arg2[%c0_3, %c0_4] : memref<2x1024xf32, #tpu.memory_space<vmem>>, vector<2x1024xf32>
    tpu.vector_store %arg2[%c0_3, %c0_4], %8 {strides = array<i32>} : memref<2x1024xf32, #tpu.memory_space<vmem>>, vector<2x1024xf32>,
    return
  }
  func.func @transform_0(%arg0: i32) -> (i32, i32) {
    %c0_i32 = arith.constant 0 : i32
    %c0_i32_0 = arith.constant 0 : i32
    return %arg0, %c0_i32 : i32, i32
  }
  func.func @transform_1(%arg0: i32) -> (i32, i32) {
    %c0_i32 = arith.constant 0 : i32
    %c0_i32_0 = arith.constant 0 : i32
    return %arg0, %c0_i32 : i32, i32
  }
}

</mosaic_0001>

<bundles_post_ra>
// kernel: tpu_custom_call.1
= control target key start
LH: loop header
LB: loop body
LE: loop exit
PB: predicated region body
PF: predicated region fallthrough
CT: control target
= control target key end

     0   :  { %6 = vsyncpa [#allocation3], 0  ;;  %s132_s0 = inlined_call_operand.hbm [shape: f32[2,1024], index: 0, kind: input, shape index: {}]   ;;  %s133_s1 = inlined_call_operand.hbm [shape: f32[2,1024], index: 1, kind: output, shape index: {}]  }
   0x1   :  { %7 = vsyncpa [#allocation4], 0  ;;  %s13_s8 = sshll.u32 %s132_s0, 4  ;;  %s114_s9 = smov [#allocation2]   ;;  %s14_s8 = int_to_ptr.hbm [resolvable:$true] %s13_s8 }
   0x2   :  { %s15_s10 = sshll.u32 %s114_s9, 4  ;;  %s16_s10 = int_to_ptr.vmem [resolvable:$true] %s15_s10 }
   0x3   :  { %18 = dma.hbm_to_vmem [thread:$0]  %s14_s8, 256, %s16_s10, [#allocation3]  }
   0x4   :  { %110 = dma.done.wait [#allocation3], 256  }
   0x5   :  { %111 = vsyncadd [#allocation3], 4294967040  ;;  %v23_v0 = vld [vmem:[#allocation2] sm:$0xff]  ;;  %v24_v1 = vld [vmem:[#allocation2 + $0x8] sm:$0xff]  ;;  %s115_s11 = smov [#allocation5]   ;;  %s44_s0 = sshll.u32 %s133_s1, 4  ;;  %s45_s0 = int_to_ptr.hbm [resolvable:$true] %s44_s0 }
   0x6   :  { %v27_v2 = vmul.f32 1.442695, %v23_v0  ;;  %v29_v3 = vmul.f32 1.442695, %v24_v1  ;;  %vm25_vm0 = vcmp.gt.f32.partialorder %v23_v0, 0.0  ;;  %s42_s12 = sshll.u32 %s115_s11, 4  ;;  %s43_s12 = int_to_ptr.vmem [resolvable:$true] %s42_s12 }
   0x7   :  { %vm26_vm1 = vcmp.gt.f32.partialorder %v24_v1, 0.0 }
   0x8   :  { %58 = vpow2.f32 %v27_v2 }
   0x9   :  { %60 = vpow2.f32 %v29_v3 }
   0xe   :  { %v59_v4 = vpop.eup %58 }
   0xf   :  { %v61_v5 = vpop.eup %60  ;;  %v54_v6 = vadd.f32 -1.0, %v59_v4 }
  0x10   :  { %v55_v7 = vadd.f32 -1.0, %v61_v5 }
  0x11   :  { %v33_v8 = vsel %vm25_vm0, %v23_v0, %v54_v6 }
  0x12   :  { %35 = vst [vmem:[#allocation5] sm:$0xff] %v33_v8  ;;  %v34_v9 = vsel %vm26_vm1, %v24_v1, %v55_v7 }
  0x13   :  { %36 = vst [vmem:[#allocation5 + $0x8] sm:$0xff] %v34_v9 }
  0x14   :  { %47 = dma.vmem_to_hbm [thread:$0]  %s43_s12, 256, %s45_s0, [#allocation4]  }
  0x15   :  { %112 = dma.done.wait [#allocation4], 256  }
  0x16   :  { %113 = vsyncadd [#allocation4], 4294967040 }
  0x17   :  { %52 = vsyncpa [#allocation3], 1 }
  0x18   :  { %53 = vsyncpa [#allocation4], 1 }

</bundles_post_ra>
